<compile_context>
chip_gen: v5e
topology: v5e:2x2
jax: 0.10.0
libtpu: 0.0.40
codegen_flags: <defaults>
</compile_context>

<pallas_src>
import functools

import numpy as np

import jax
import jax.numpy as jnp
from jax import lax
from jax.experimental import pallas as pl
from jax.experimental.pallas import tpu as pltpu


# ----------------------------- fused Pallas kernel ---------------------------

def _bottleneck_kernel(x_top_ref, x_body_ref, x_bot_ref,
                       w1_ref, b1_ref, w2_ref, b2_ref, w3_ref, b3_ref,
                       o_ref, p_ref, *, td, H, W, cin, planes, cout):
    """One (batch, D-tile) step of the fused bottleneck.

    x_top_ref : (1, H, W*cin)   bf16  x row d0-1 (clamped; zero-masked at the front)
    x_body_ref: (td, H, W*cin)  bf16  x rows [d0, d0+td)  (also the residual)
    x_bot_ref : (1, H, W*cin)   bf16  x row d0+td (clamped; zero-masked at the back)
    p_ref     : VMEM scratch (td+2, H+2, W*planes) bf16 -- D/H zero-padded conv2 input
    o_ref     : (td, H, W*cout) f32
    """
    dt = pl.program_id(1)
    nd = pl.num_programs(1)
    WCI = W * cin
    WP = W * planes
    WCO = W * cout

    w1 = w1_ref[...]                        # (W*cin, W*planes) bf16, BN1 scale folded
    b1 = b1_ref[...]                        # (1, W*planes)     f32

    def conv1(rows):                        # (R, W*cin) bf16 -> (R, W*planes) f32
        y = jnp.dot(rows, w1, preferred_element_type=jnp.float32)
        return jnp.maximum(y + b1, 0.0)

    # ---- conv1 + BN1 + ReLU into the D/H padded slab (W padding is baked into w2) ----
    # Zero only the two H-border faces (never written elsewhere); everything else of the
    # scratch is rewritten below, so there is no cross-grid-step carried state.
    p_ref[:, 0:1, :] = jnp.zeros((td + 2, 1, WP), p_ref.dtype)
    p_ref[:, H + 1:H + 2, :] = jnp.zeros((td + 2, 1, WP), p_ref.dtype)

    body = conv1(x_body_ref[...].reshape(td * H, WCI))          # (td*H, W*planes) f32
    p_ref[1:td + 1, 1:H + 1, :] = body.reshape(td, H, WP).astype(p_ref.dtype)

    top = conv1(x_top_ref[...].reshape(H, WCI))
    top = jnp.where(dt > 0, top, 0.0)        # conv2 zero padding at d == -1
    p_ref[0:1, 1:H + 1, :] = top.reshape(1, H, WP).astype(p_ref.dtype)

    bot = conv1(x_bot_ref[...].reshape(H, WCI))
    bot = jnp.where(dt < nd - 1, bot, 0.0)   # conv2 zero padding at d == D
    p_ref[td + 1:td + 2, 1:H + 1, :] = bot.reshape(1, H, WP).astype(p_ref.dtype)

    # ---- conv2 (3x3x3, pad=1) + BN2 + ReLU: 9 banded matmuls (one per (kd, kh)) ------
    acc = jnp.zeros((td * H, WP), jnp.float32)
    for kd in range(3):
        for kh in range(3):
            xs = p_ref[kd:kd + td, kh:kh + H, :].reshape(td * H, WP)
            acc = acc + jnp.dot(xs, w2_ref[kd * 3 + kh],
                                preferred_element_type=jnp.float32)
    out2 = jnp.maximum(acc + b2_ref[...], 0.0)                   # (td*H, W*planes) f32

    # ---- conv3 (1x1x1) + BN3 + residual + ReLU ---------------------------------------
    y = jnp.dot(out2.astype(jnp.bfloat16), w3_ref[...],
                preferred_element_type=jnp.float32)              # (td*H, W*cout) f32
    y = y + b3_ref[...] + x_body_ref[...].reshape(td * H, WCO).astype(jnp.float32)
    o_ref[...] = jnp.maximum(y, 0.0).reshape(td, H, WCO)


# ----------------------------- wrapper ----------------------------------------

def _pick_d_tile(D, N, max_td=8):
    """Largest divisor of D <= max_td.

    After the lane-dense folding the per-step VMEM footprint is tiny; the D tile is
    bounded by vector-register pressure (intermediates stay register-resident), hence
    the small cap.  When N == 1, guarantee >= 2 grid steps so both TensorCores of a
    v7x megacore get work.
    """
    cap = max_td
    if N == 1 and D >= 2:
        cap = min(cap, D // 2)
    cap = max(cap, 1)
    for td in range(min(cap, D), 0, -1):
        if D % td == 0:
            return td
    return 1


def bottleneck_forward(x_ncdhw, kparams, *, d_tile=None):
    """Fused Bottleneck forward (stride=1, dilation=1, downsample=None). NCDHW in/out."""
    N, cin, D, H, W = x_ncdhw.shape
    planes = kparams["planes"]
    cout = kparams["cout"]
    assert cout == cin, "identity residual requires inplanes == 4 * planes"

    td = d_tile if d_tile is not None else _pick_d_tile(D, N)
    assert D % td == 0, f"D={D} must be divisible by d_tile={td}"
    nd = D // td

    WCI, WP, WCO = W * cin, W * planes, W * cout

    # One relayout in: NCDHW -> (N, D, H, W*Cin), bf16 activations (halved input DMA).
    x = jnp.transpose(x_ncdhw, (0, 2, 3, 4, 1)).reshape(N, D, H, WCI).astype(jnp.bfloat16)

    kernel = functools.partial(_bottleneck_kernel, td=td, H=H, W=W,
                               cin=cin, planes=planes, cout=cout)

    out = pl.pallas_call(
        kernel,
        out_shape=jax.ShapeDtypeStruct((N, D, H, WCO), jnp.float32),
        grid=(N, nd),
        in_specs=[
            # x, three views: D-halo row above, body rows, D-halo row below.
            pl.BlockSpec((None, 1, H, WCI),
                         lambda n, dt: (n, jnp.maximum(dt * td - 1, 0), 0, 0)),
            pl.BlockSpec((None, td, H, WCI), lambda n, dt: (n, dt, 0, 0)),
            pl.BlockSpec((None, 1, H, WCI),
                         lambda n, dt: (n, jnp.minimum((dt + 1) * td, D - 1), 0, 0)),
            # folded weights / biases (same block every grid step)
            pl.BlockSpec((WCI, WP), lambda n, dt: (0, 0)),        # w1 block-diag
            pl.BlockSpec((1, WP), lambda n, dt: (0, 0)),          # b1
            pl.BlockSpec((9, WP, WP), lambda n, dt: (0, 0, 0)),   # w2 band matrices
            pl.BlockSpec((1, WP), lambda n, dt: (0, 0)),          # b2
            pl.BlockSpec((WP, WCO), lambda n, dt: (0, 0)),        # w3 block-diag
            pl.BlockSpec((1, WCO), lambda n, dt: (0, 0)),         # b3
        ],
        out_specs=pl.BlockSpec((None, td, H, WCO), lambda n, dt: (n, dt, 0, 0)),
        scratch_shapes=[pltpu.VMEM((td + 2, H + 2, WP), jnp.bfloat16)],
        compiler_params=pltpu.CompilerParams(
            dimension_semantics=("parallel", "parallel"),   # no carried state across steps
            vmem_limit_bytes=32 * 1024 * 1024),             # safe on v5e/v6e/v7x
    )(x, x, x, kparams["w1"], kparams["b1"], kparams["w2"], kparams["b2"],
      kparams["w3"], kparams["b3"])

    # One relayout out: (N, D, H, W*Cout) -> NCDHW.
    return jnp.transpose(out.reshape(N, D, H, W, cout), (0, 4, 1, 2, 3))


# ----------------------------- params -----------------------------------------

def _fold_bn(gamma, beta, mean, var, eps=1e-5):
    scale = gamma / jnp.sqrt(var + eps)
    bias = beta - mean * scale
    return scale, bias


def init_params(key, inplanes, planes):
    """Raw PyTorch-layout parameters: conv weights (Cout, Cin, kD, kH, kW), BN stats."""
    expansion = 4
    ks = jax.random.split(key, 6)
    w1 = 0.2 * jax.random.normal(ks[0], (planes, inplanes, 1, 1, 1), jnp.float32)
    w2 = 0.2 * jax.random.normal(ks[1], (planes, planes, 3, 3, 3), jnp.float32)
    w3 = 0.2 * jax.random.normal(ks[2], (planes * expansion, planes, 1, 1, 1), jnp.float32)

    def bn(k, c):
        k1, k2, k3, k4 = jax.random.split(k, 4)
        gamma = 1.0 + 0.1 * jax.random.normal(k1, (c,), jnp.float32)
        beta = 0.1 * jax.random.normal(k2, (c,), jnp.float32)
        mean = 0.1 * jax.random.normal(k3, (c,), jnp.float32)
        var = 0.5 + jnp.abs(jax.random.normal(k4, (c,), jnp.float32))
        return gamma, beta, mean, var

    return dict(w1=w1, w2=w2, w3=w3,
                bn1=bn(ks[3], planes), bn2=bn(ks[4], planes), bn3=bn(ks[5], planes * expansion))


def build_kernel_params(params, H, W):
    """Fold BN (inference) into the conv weights and bake the lane-dense layout in.

    conv1/conv3 -> block-diagonal (W*Cin, W*planes) / (W*planes, W*Cout) matrices.
    conv2       -> 9 (W*planes, W*planes) band matrices (one per (kd, kh) tap) that
                   encode the kw shifts and the W zero padding.
    Matmul weights are bf16, biases f32.
    """
    w1 = np.asarray(params["w1"], np.float32)   # (planes, cin, 1, 1, 1)
    w2 = np.asarray(params["w2"], np.float32)   # (planes, planes, 3, 3, 3)
    w3 = np.asarray(params["w3"], np.float32)   # (cout, planes, 1, 1, 1)
    s1, b1 = (np.asarray(a, np.float32) for a in _fold_bn(*params["bn1"]))
    s2, b2 = (np.asarray(a, np.float32) for a in _fold_bn(*params["bn2"]))
    s3, b3 = (np.asarray(a, np.float32) for a in _fold_bn(*params["bn3"]))

    planes, cin = w1.shape[0], w1.shape[1]
    cout = w3.shape[0]
    P = planes

    w1f = w1[:, :, 0, 0, 0].T * s1[None, :]           # (cin, planes), BN1 scale folded
    w3f = w3[:, :, 0, 0, 0].T * s3[None, :]           # (planes, cout), BN3 scale folded

    w1_big = np.kron(np.eye(W, dtype=np.float32), w1f)    # (W*cin, W*planes)
    w3_big = np.kron(np.eye(W, dtype=np.float32), w3f)    # (W*planes, W*cout)

    w2_band = np.zeros((9, W * P, W * P), np.float32)      # per (kd, kh): kw band + W padding
    for kd in range(3):
        for kh in range(3):
            t = kd * 3 + kh
            for wo in range(W):
                for kw in range(3):
                    wi = wo + kw - 1
                    if not 0 <= wi < W:
                        continue
                    w2_band[t, wi * P:(wi + 1) * P, wo * P:(wo + 1) * P] = \
                        w2[:, :, kd, kh, kw].T * s2[None, :]

    return dict(
        planes=planes, cout=cout,
        w1=jnp.asarray(w1_big, jnp.bfloat16),
        w2=jnp.asarray(w2_band, jnp.bfloat16),
        w3=jnp.asarray(w3_big, jnp.bfloat16),
        b1=jnp.asarray(np.tile(b1, W)[None, :], jnp.float32),
        b2=jnp.asarray(np.tile(b2, W)[None, :], jnp.float32),
        b3=jnp.asarray(np.tile(b3, W)[None, :], jnp.float32),
    )


# ----------------------------- reference ---------------------------------------

def reference_forward(x, params, eps=1e-5):
    dn = ("NCDHW", "OIDHW", "NCDHW")

    def conv(inp, w, padding):
        return lax.conv_general_dilated(inp, w, window_strides=(1, 1, 1),
                                        padding=padding, dimension_numbers=dn,
                                        precision=lax.Precision.HIGHEST)

    def bn(inp, p):
        gamma, beta, mean, var = p
        shp = (1, -1, 1, 1, 1)
        return (inp - mean.reshape(shp)) / jnp.sqrt(var.reshape(shp) + eps) \
            * gamma.reshape(shp) + beta.reshape(shp)

    out = jax.nn.relu(bn(conv(x, params["w1"], [(0, 0)] * 3), params["bn1"]))
    out = jax.nn.relu(bn(conv(out, params["w2"], [(1, 1)] * 3), params["bn2"]))
    out = bn(conv(out, params["w3"], [(0, 0)] * 3), params["bn3"])
    return jax.nn.relu(out + x)


# ----------------------------- main ---------------------------------------------

if __name__ == "__main__":
    key = jax.random.PRNGKey(0)
    kx, kp = jax.random.split(key)

    # Bottleneck(inplanes=16, planes=4): identity residual needs inplanes == 4 * planes.
    # W * inplanes == 128 makes the kernel I/O exactly lane-dense.
    inplanes, planes = 16, 4
    N, D, H, W = 2, 8, 8, 8

    x = jax.random.normal(kx, (N, inplanes, D, H, W), jnp.float32)
    params = init_params(kp, inplanes, planes)
    kparams = build_kernel_params(params, H, W)

    ref = reference_forward(x, params)

    # Exercise interior + boundary halo tiles (td=2,4) and the auto-picked tile,
    # verifying against the f32 reference each time.
    for d_tile in (2, 4, None):
        out = jax.block_until_ready(bottleneck_forward(x, kparams, d_tile=d_tile))
        assert out.shape == (N, inplanes, D, H, W), out.shape
        max_err = float(jnp.max(jnp.abs(out - ref)))
        # bf16 matmul operands / bf16 activations at the boundary, f32 accumulation.
        assert jnp.allclose(out, ref, atol=5e-2, rtol=5e-2), \
            f"d_tile={d_tile}: max abs err {max_err}"

    print("KERNEL_OK")
</pallas_src>

<mosaic_0001>
module attributes {stable_mosaic.version = 11 : i64} {
  func.func @_bottleneck_kernel(%arg0: i32, %arg1: i32, %arg2: memref<1x1x8x128xbf16, #tpu.memory_space<vmem>>, %arg3: memref<1x2x8x128xbf16, #tpu.memory_space<vmem>>, %arg4: memref<1x1x8x128xbf16, #tpu.memory_space<vmem>>, %arg5: memref<128x32xbf16, #tpu.memory_space<vmem>>, %arg6: memref<1x32xf32, #tpu.memory_space<vmem>>, %arg7: memref<9x32x32xbf16, #tpu.memory_space<vmem>>, %arg8: memref<1x32xf32, #tpu.memory_space<vmem>>, %arg9: memref<32x128xbf16, #tpu.memory_space<vmem>>, %arg10: memref<1x128xf32, #tpu.memory_space<vmem>>, %arg11: memref<1x2x8x128xf32, #tpu.memory_space<vmem>>, %arg12: memref<4x10x32xbf16, #tpu.memory_space<vmem>>) attributes {dimension_semantics = [#tpu.dimension_semantics<parallel>, #tpu.dimension_semantics<parallel>], iteration_bounds = array<i64: 2, 4>, scalar_prefetch = 0 : i64, scratch_operands = 1 : i64, tpu.core_type = #tpu.core_type<tc>, window_params = [{transform_indices = @transform_0, window_bounds = array<i64: 1, 1, 8, 128>}, {transform_indices = @transform_1, window_bounds = array<i64: 1, 2, 8, 128>}, {transform_indices = @transform_2, window_bounds = array<i64: 1, 1, 8, 128>}, {pipeline_mode = #tpu.pipeline_mode<synchronous>, transform_indices = @transform_3, window_bounds = array<i64: 128, 32>}, {pipeline_mode = #tpu.pipeline_mode<synchronous>, transform_indices = @transform_4, window_bounds = array<i64: 1, 32>}, {pipeline_mode = #tpu.pipeline_mode<synchronous>, transform_indices = @transform_5, window_bounds = array<i64: 9, 32, 32>}, {pipeline_mode = #tpu.pipeline_mode<synchronous>, transform_indices = @transform_6, window_bounds = array<i64: 1, 32>}, {pipeline_mode = #tpu.pipeline_mode<synchronous>, transform_indices = @transform_7, window_bounds = array<i64: 32, 128>}, {pipeline_mode = #tpu.pipeline_mode<synchronous>, transform_indices = @transform_8, window_bounds = array<i64: 1, 128>}, {transform_indices = @transform_9, window_bounds = array<i64: 1, 2, 8, 128>}]} {
    %c0 = arith.constant 0 : index
    %c0_0 = arith.constant 0 : index
    %0 = vector.load %arg5[%c0, %c0_0] : memref<128x32xbf16, #tpu.memory_space<vmem>>, vector<128x32xbf16>
    %c0_1 = arith.constant 0 : index
    %c0_2 = arith.constant 0 : index
    %1 = vector.load %arg6[%c0_1, %c0_2] : memref<1x32xf32, #tpu.memory_space<vmem>>, vector<1x32xf32>
    %cst = arith.constant 0.000000e+00 : bf16
    %2 = vector.broadcast %cst : bf16 to vector<4x1x32xbf16>
    %c0_3 = arith.constant 0 : index
    %c0_4 = arith.constant 0 : index
    %c0_5 = arith.constant 0 : index
    %3 = vector.load %arg12[%c0_3, %c0_4, %c0_5] : memref<4x10x32xbf16, #tpu.memory_space<vmem>>, vector<4x1x32xbf16>
    tpu.vector_store %arg12[%c0_3, %c0_4, %c0_5], %2 {strides = array<i32>} : memref<4x10x32xbf16, #tpu.memory_space<vmem>>, vector<4x1x32xbf16>,
    %cst_6 = arith.constant 0.000000e+00 : bf16
    %4 = vector.broadcast %cst_6 : bf16 to vector<4x1x32xbf16>
    %c0_7 = arith.constant 0 : index
    %c9 = arith.constant 9 : index
    %c0_8 = arith.constant 0 : index
    %5 = vector.load %arg12[%c0_7, %c9, %c0_8] : memref<4x10x32xbf16, #tpu.memory_space<vmem>>, vector<4x1x32xbf16>
    tpu.vector_store %arg12[%c0_7, %c9, %c0_8], %4 {strides = array<i32>} : memref<4x10x32xbf16, #tpu.memory_space<vmem>>, vector<4x1x32xbf16>,
    %c0_9 = arith.constant 0 : index
    %c0_10 = arith.constant 0 : index
    %c0_11 = arith.constant 0 : index
    %c0_12 = arith.constant 0 : index
    %6 = vector.load %arg3[%c0_9, %c0_10, %c0_11, %c0_12] : memref<1x2x8x128xbf16, #tpu.memory_space<vmem>>, vector<1x2x8x128xbf16>
    %7 = vector.shape_cast %6 : vector<1x2x8x128xbf16> to vector<2x8x128xbf16>
    %8 = vector.shape_cast %7 : vector<2x8x128xbf16> to vector<16x128xbf16>
    %cst_13 = arith.constant dense<0.000000e+00> : vector<16x32xf32>
    %9 = tpu.matmul %8, %0, %cst_13 {dimension_numbers = #tpu.dot_dimension_numbers<[1], [0], [0], [1], [0, 0, 1, 1], [], []>} : vector<16x128xbf16>, vector<128x32xbf16>, vector<16x32xf32> -> vector<16x32xf32>
    %10 = vector.broadcast %1 : vector<1x32xf32> to vector<16x32xf32>
    %11 = arith.addf %9, %10 : vector<16x32xf32>
    %cst_14 = arith.constant 0.000000e+00 : f32
    %12 = vector.broadcast %cst_14 : f32 to vector<16x32xf32>
    %13 = arith.maximumf %11, %12 : vector<16x32xf32>
    %14 = vector.shape_cast %13 : vector<16x32xf32> to vector<2x8x32xf32>
    %15 = arith.truncf %14 : vector<2x8x32xf32> to vector<2x8x32xbf16>
    %c1 = arith.constant 1 : index
    %c1_15 = arith.constant 1 : index
    %c0_16 = arith.constant 0 : index
    %16 = vector.load %arg12[%c1, %c1_15, %c0_16] : memref<4x10x32xbf16, #tpu.memory_space<vmem>>, vector<2x8x32xbf16>
    tpu.vector_store %arg12[%c1, %c1_15, %c0_16], %15 {strides = array<i32>} : memref<4x10x32xbf16, #tpu.memory_space<vmem>>, vector<2x8x32xbf16>,
    %c0_17 = arith.constant 0 : index
    %c0_18 = arith.constant 0 : index
    %c0_19 = arith.constant 0 : index
    %c0_20 = arith.constant 0 : index
    %17 = vector.load %arg2[%c0_17, %c0_18, %c0_19, %c0_20] : memref<1x1x8x128xbf16, #tpu.memory_space<vmem>>, vector<1x1x8x128xbf16>
    %18 = vector.shape_cast %17 : vector<1x1x8x128xbf16> to vector<1x8x128xbf16>
    %19 = vector.shape_cast %18 : vector<1x8x128xbf16> to vector<8x128xbf16>
    %cst_21 = arith.constant dense<0.000000e+00> : vector<8x32xf32>
    %20 = tpu.matmul %19, %0, %cst_21 {dimension_numbers = #tpu.dot_dimension_numbers<[1], [0], [0], [1], [0, 0, 1, 1], [], []>} : vector<8x128xbf16>, vector<128x32xbf16>, vector<8x32xf32> -> vector<8x32xf32>
    %21 = vector.broadcast %1 : vector<1x32xf32> to vector<8x32xf32>
    %22 = arith.addf %20, %21 : vector<8x32xf32>
    %cst_22 = arith.constant 0.000000e+00 : f32
    %23 = vector.broadcast %cst_22 : f32 to vector<8x32xf32>
    %24 = arith.maximumf %22, %23 : vector<8x32xf32>
    %c0_i32 = arith.constant 0 : i32
    %25 = arith.cmpi sgt, %arg1, %c0_i32 : i32
    %cst_23 = arith.constant 0.000000e+00 : f32
    %26 = vector.broadcast %cst_23 : f32 to vector<8x32xf32>
    %27 = arith.select %25, %24, %26 : vector<8x32xf32>
    %28 = vector.shape_cast %27 : vector<8x32xf32> to vector<1x8x32xf32>
    %29 = arith.truncf %28 : vector<1x8x32xf32> to vector<1x8x32xbf16>
    %c0_24 = arith.constant 0 : index
    %c1_25 = arith.constant 1 : index
    %c0_26 = arith.constant 0 : index
    %30 = vector.load %arg12[%c0_24, %c1_25, %c0_26] : memref<4x10x32xbf16, #tpu.memory_space<vmem>>, vector<1x8x32xbf16>
    tpu.vector_store %arg12[%c0_24, %c1_25, %c0_26], %29 {strides = array<i32>} : memref<4x10x32xbf16, #tpu.memory_space<vmem>>, vector<1x8x32xbf16>,
    %c0_27 = arith.constant 0 : index
    %c0_28 = arith.constant 0 : index
    %c0_29 = arith.constant 0 : index
    %c0_30 = arith.constant 0 : index
    %31 = vector.load %arg4[%c0_27, %c0_28, %c0_29, %c0_30] : memref<1x1x8x128xbf16, #tpu.memory_space<vmem>>, vector<1x1x8x128xbf16>
    %32 = vector.shape_cast %31 : vector<1x1x8x128xbf16> to vector<1x8x128xbf16>
    %33 = vector.shape_cast %32 : vector<1x8x128xbf16> to vector<8x128xbf16>
    %cst_31 = arith.constant dense<0.000000e+00> : vector<8x32xf32>
    %34 = tpu.matmul %33, %0, %cst_31 {dimension_numbers = #tpu.dot_dimension_numbers<[1], [0], [0], [1], [0, 0, 1, 1], [], []>} : vector<8x128xbf16>, vector<128x32xbf16>, vector<8x32xf32> -> vector<8x32xf32>
    %35 = vector.broadcast %1 : vector<1x32xf32> to vector<8x32xf32>
    %36 = arith.addf %34, %35 : vector<8x32xf32>
    %cst_32 = arith.constant 0.000000e+00 : f32
    %37 = vector.broadcast %cst_32 : f32 to vector<8x32xf32>
    %38 = arith.maximumf %36, %37 : vector<8x32xf32>
    %c3_i32 = arith.constant 3 : i32
    %39 = arith.cmpi slt, %arg1, %c3_i32 : i32
    %cst_33 = arith.constant 0.000000e+00 : f32
    %40 = vector.broadcast %cst_33 : f32 to vector<8x32xf32>
    %41 = arith.select %39, %38, %40 : vector<8x32xf32>
    %42 = vector.shape_cast %41 : vector<8x32xf32> to vector<1x8x32xf32>
    %43 = arith.truncf %42 : vector<1x8x32xf32> to vector<1x8x32xbf16>
    %c3 = arith.constant 3 : index
    %c1_34 = arith.constant 1 : index
    %c0_35 = arith.constant 0 : index
    %44 = vector.load %arg12[%c3, %c1_34, %c0_35] : memref<4x10x32xbf16, #tpu.memory_space<vmem>>, vector<1x8x32xbf16>
    tpu.vector_store %arg12[%c3, %c1_34, %c0_35], %43 {strides = array<i32>} : memref<4x10x32xbf16, #tpu.memory_space<vmem>>, vector<1x8x32xbf16>,
    %cst_36 = arith.constant 0.000000e+00 : f32
    %45 = vector.broadcast %cst_36 : f32 to vector<16x32xf32>
    %c0_37 = arith.constant 0 : index
    %c0_38 = arith.constant 0 : index
    %c0_39 = arith.constant 0 : index
    %46 = vector.load %arg12[%c0_37, %c0_38, %c0_39] : memref<4x10x32xbf16, #tpu.memory_space<vmem>>, vector<2x8x32xbf16>
    %47 = vector.shape_cast %46 : vector<2x8x32xbf16> to vector<16x32xbf16>
    %c0_40 = arith.constant 0 : index
    %c0_41 = arith.constant 0 : index
    %c0_42 = arith.constant 0 : index
    %48 = vector.load %arg7[%c0_40, %c0_41, %c0_42] : memref<9x32x32xbf16, #tpu.memory_space<vmem>>, vector<1x32x32xbf16>
    %49 = vector.shape_cast %48 : vector<1x32x32xbf16> to vector<32x32xbf16>
    %cst_43 = arith.constant dense<0.000000e+00> : vector<16x32xf32>
    %50 = tpu.matmul %47, %49, %cst_43 {dimension_numbers = #tpu.dot_dimension_numbers<[1], [0], [0], [1], [0, 0, 1, 1], [], []>} : vector<16x32xbf16>, vector<32x32xbf16>, vector<16x32xf32> -> vector<16x32xf32>
    %51 = arith.addf %45, %50 : vector<16x32xf32>
    %c0_44 = arith.constant 0 : index
    %c1_45 = arith.constant 1 : index
    %c0_46 = arith.constant 0 : index
    %52 = vector.load %arg12[%c0_44, %c1_45, %c0_46] : memref<4x10x32xbf16, #tpu.memory_space<vmem>>, vector<2x8x32xbf16>
    %53 = vector.shape_cast %52 : vector<2x8x32xbf16> to vector<16x32xbf16>
    %c1_47 = arith.constant 1 : index
    %c0_48 = arith.constant 0 : index
    %c0_49 = arith.constant 0 : index
    %54 = vector.load %arg7[%c1_47, %c0_48, %c0_49] : memref<9x32x32xbf16, #tpu.memory_space<vmem>>, vector<1x32x32xbf16>
    %55 = vector.shape_cast %54 : vector<1x32x32xbf16> to vector<32x32xbf16>
    %cst_50 = arith.constant dense<0.000000e+00> : vector<16x32xf32>
    %56 = tpu.matmul %53, %55, %cst_50 {dimension_numbers = #tpu.dot_dimension_numbers<[1], [0], [0], [1], [0, 0, 1, 1], [], []>} : vector<16x32xbf16>, vector<32x32xbf16>, vector<16x32xf32> -> vector<16x32xf32>
    %57 = arith.addf %51, %56 : vector<16x32xf32>
    %c0_51 = arith.constant 0 : index
    %c2 = arith.constant 2 : index
    %c0_52 = arith.constant 0 : index
    %58 = vector.load %arg12[%c0_51, %c2, %c0_52] : memref<4x10x32xbf16, #tpu.memory_space<vmem>>, vector<2x8x32xbf16>
    %59 = vector.shape_cast %58 : vector<2x8x32xbf16> to vector<16x32xbf16>
    %c2_53 = arith.constant 2 : index
    %c0_54 = arith.constant 0 : index
    %c0_55 = arith.constant 0 : index
    %60 = vector.load %arg7[%c2_53, %c0_54, %c0_55] : memref<9x32x32xbf16, #tpu.memory_space<vmem>>, vector<1x32x32xbf16>
    %61 = vector.shape_cast %60 : vector<1x32x32xbf16> to vector<32x32xbf16>
    %cst_56 = arith.constant dense<0.000000e+00> : vector<16x32xf32>
    %62 = tpu.matmul %59, %61, %cst_56 {dimension_numbers = #tpu.dot_dimension_numbers<[1], [0], [0], [1], [0, 0, 1, 1], [], []>} : vector<16x32xbf16>, vector<32x32xbf16>, vector<16x32xf32> -> vector<16x32xf32>
    %63 = arith.addf %57, %62 : vector<16x32xf32>
    %c1_57 = arith.constant 1 : index
    %c0_58 = arith.constant 0 : index
    %c0_59 = arith.constant 0 : index
    %64 = vector.load %arg12[%c1_57, %c0_58, %c0_59] : memref<4x10x32xbf16, #tpu.memory_space<vmem>>, vector<2x8x32xbf16>
    %65 = vector.shape_cast %64 : vector<2x8x32xbf16> to vector<16x32xbf16>
    %c3_60 = arith.constant 3 : index
    %c0_61 = arith.constant 0 : index
    %c0_62 = arith.constant 0 : index
    %66 = vector.load %arg7[%c3_60, %c0_61, %c0_62] : memref<9x32x32xbf16, #tpu.memory_space<vmem>>, vector<1x32x32xbf16>
    %67 = vector.shape_cast %66 : vector<1x32x32xbf16> to vector<32x32xbf16>
    %cst_63 = arith.constant dense<0.000000e+00> : vector<16x32xf32>
    %68 = tpu.matmul %65, %67, %cst_63 {dimension_numbers = #tpu.dot_dimension_numbers<[1], [0], [0], [1], [0, 0, 1, 1], [], []>} : vector<16x32xbf16>, vector<32x32xbf16>, vector<16x32xf32> -> vector<16x32xf32>
    %69 = arith.addf %63, %68 : vector<16x32xf32>
    %c1_64 = arith.constant 1 : index
    %c1_65 = arith.constant 1 : index
    %c0_66 = arith.constant 0 : index
    %70 = vector.load %arg12[%c1_64, %c1_65, %c0_66] : memref<4x10x32xbf16, #tpu.memory_space<vmem>>, vector<2x8x32xbf16>
    %71 = vector.shape_cast %70 : vector<2x8x32xbf16> to vector<16x32xbf16>
    %c4 = arith.constant 4 : index
    %c0_67 = arith.constant 0 : index
    %c0_68 = arith.constant 0 : index
    %72 = vector.load %arg7[%c4, %c0_67, %c0_68] : memref<9x32x32xbf16, #tpu.memory_space<vmem>>, vector<1x32x32xbf16>
    %73 = vector.shape_cast %72 : vector<1x32x32xbf16> to vector<32x32xbf16>
    %cst_69 = arith.constant dense<0.000000e+00> : vector<16x32xf32>
    %74 = tpu.matmul %71, %73, %cst_69 {dimension_numbers = #tpu.dot_dimension_numbers<[1], [0], [0], [1], [0, 0, 1, 1], [], []>} : vector<16x32xbf16>, vector<32x32xbf16>, vector<16x32xf32> -> vector<16x32xf32>
    %75 = arith.addf %69, %74 : vector<16x32xf32>
    %c1_70 = arith.constant 1 : index
    %c2_71 = arith.constant 2 : index
    %c0_72 = arith.constant 0 : index
    %76 = vector.load %arg12[%c1_70, %c2_71, %c0_72] : memref<4x10x32xbf16, #tpu.memory_space<vmem>>, vector<2x8x32xbf16>
    %77 = vector.shape_cast %76 : vector<2x8x32xbf16> to vector<16x32xbf16>
    %c5 = arith.constant 5 : index
    %c0_73 = arith.constant 0 : index
    %c0_74 = arith.constant 0 : index
    %78 = vector.load %arg7[%c5, %c0_73, %c0_74] : memref<9x32x32xbf16, #tpu.memory_space<vmem>>, vector<1x32x32xbf16>
    %79 = vector.shape_cast %78 : vector<1x32x32xbf16> to vector<32x32xbf16>
    %cst_75 = arith.constant dense<0.000000e+00> : vector<16x32xf32>
    %80 = tpu.matmul %77, %79, %cst_75 {dimension_numbers = #tpu.dot_dimension_numbers<[1], [0], [0], [1], [0, 0, 1, 1], [], []>} : vector<16x32xbf16>, vector<32x32xbf16>, vector<16x32xf32> -> vector<16x32xf32>
    %81 = arith.addf %75, %80 : vector<16x32xf32>
    %c2_76 = arith.constant 2 : index
    %c0_77 = arith.constant 0 : index
    %c0_78 = arith.constant 0 : index
    %82 = vector.load %arg12[%c2_76, %c0_77, %c0_78] : memref<4x10x32xbf16, #tpu.memory_space<vmem>>, vector<2x8x32xbf16>
    %83 = vector.shape_cast %82 : vector<2x8x32xbf16> to vector<16x32xbf16>
    %c6 = arith.constant 6 : index
    %c0_79 = arith.constant 0 : index
    %c0_80 = arith.constant 0 : index
    %84 = vector.load %arg7[%c6, %c0_79, %c0_80] : memref<9x32x32xbf16, #tpu.memory_space<vmem>>, vector<1x32x32xbf16>
    %85 = vector.shape_cast %84 : vector<1x32x32xbf16> to vector<32x32xbf16>
    %cst_81 = arith.constant dense<0.000000e+00> : vector<16x32xf32>
    %86 = tpu.matmul %83, %85, %cst_81 {dimension_numbers = #tpu.dot_dimension_numbers<[1], [0], [0], [1], [0, 0, 1, 1], [], []>} : vector<16x32xbf16>, vector<32x32xbf16>, vector<16x32xf32> -> vector<16x32xf32>
    %87 = arith.addf %81, %86 : vector<16x32xf32>
    %c2_82 = arith.constant 2 : index
    %c1_83 = arith.constant 1 : index
    %c0_84 = arith.constant 0 : index
    %88 = vector.load %arg12[%c2_82, %c1_83, %c0_84] : memref<4x10x32xbf16, #tpu.memory_space<vmem>>, vector<2x8x32xbf16>
    %89 = vector.shape_cast %88 : vector<2x8x32xbf16> to vector<16x32xbf16>
    %c7 = arith.constant 7 : index
    %c0_85 = arith.constant 0 : index
    %c0_86 = arith.constant 0 : index
    %90 = vector.load %arg7[%c7, %c0_85, %c0_86] : memref<9x32x32xbf16, #tpu.memory_space<vmem>>, vector<1x32x32xbf16>
    %91 = vector.shape_cast %90 : vector<1x32x32xbf16> to vector<32x32xbf16>
    %cst_87 = arith.constant dense<0.000000e+00> : vector<16x32xf32>
    %92 = tpu.matmul %89, %91, %cst_87 {dimension_numbers = #tpu.dot_dimension_numbers<[1], [0], [0], [1], [0, 0, 1, 1], [], []>} : vector<16x32xbf16>, vector<32x32xbf16>, vector<16x32xf32> -> vector<16x32xf32>
    %93 = arith.addf %87, %92 : vector<16x32xf32>
    %c2_88 = arith.constant 2 : index
    %c2_89 = arith.constant 2 : index
    %c0_90 = arith.constant 0 : index
    %94 = vector.load %arg12[%c2_88, %c2_89, %c0_90] : memref<4x10x32xbf16, #tpu.memory_space<vmem>>, vector<2x8x32xbf16>
    %95 = vector.shape_cast %94 : vector<2x8x32xbf16> to vector<16x32xbf16>
    %c8 = arith.constant 8 : index
    %c0_91 = arith.constant 0 : index
    %c0_92 = arith.constant 0 : index
    %96 = vector.load %arg7[%c8, %c0_91, %c0_92] : memref<9x32x32xbf16, #tpu.memory_space<vmem>>, vector<1x32x32xbf16>
    %97 = vector.shape_cast %96 : vector<1x32x32xbf16> to vector<32x32xbf16>
    %cst_93 = arith.constant dense<0.000000e+00> : vector<16x32xf32>
    %98 = tpu.matmul %95, %97, %cst_93 {dimension_numbers = #tpu.dot_dimension_numbers<[1], [0], [0], [1], [0, 0, 1, 1], [], []>} : vector<16x32xbf16>, vector<32x32xbf16>, vector<16x32xf32> -> vector<16x32xf32>
    %99 = arith.addf %93, %98 : vector<16x32xf32>
    %c0_94 = arith.constant 0 : index
    %c0_95 = arith.constant 0 : index
    %100 = vector.load %arg8[%c0_94, %c0_95] : memref<1x32xf32, #tpu.memory_space<vmem>>, vector<1x32xf32>
    %101 = vector.broadcast %100 : vector<1x32xf32> to vector<16x32xf32>
    %102 = arith.addf %99, %101 : vector<16x32xf32>
    %cst_96 = arith.constant 0.000000e+00 : f32
    %103 = vector.broadcast %cst_96 : f32 to vector<16x32xf32>
    %104 = arith.maximumf %102, %103 : vector<16x32xf32>
    %105 = arith.truncf %104 : vector<16x32xf32> to vector<16x32xbf16>
    %c0_97 = arith.constant 0 : index
    %c0_98 = arith.constant 0 : index
    %106 = vector.load %arg9[%c0_97, %c0_98] : memref<32x128xbf16, #tpu.memory_space<vmem>>, vector<32x128xbf16>
    %cst_99 = arith.constant dense<0.000000e+00> : vector<16x128xf32>
    %107 = tpu.matmul %105, %106, %cst_99 {dimension_numbers = #tpu.dot_dimension_numbers<[1], [0], [0], [1], [0, 0, 1, 1], [], []>} : vector<16x32xbf16>, vector<32x128xbf16>, vector<16x128xf32> -> vector<16x128xf32>
    %c0_100 = arith.constant 0 : index
    %c0_101 = arith.constant 0 : index
    %108 = vector.load %arg10[%c0_100, %c0_101] : memref<1x128xf32, #tpu.memory_space<vmem>>, vector<1x128xf32>
    %109 = vector.broadcast %108 : vector<1x128xf32> to vector<16x128xf32>
    %110 = arith.addf %107, %109 : vector<16x128xf32>
    %c0_102 = arith.constant 0 : index
    %c0_103 = arith.constant 0 : index
    %c0_104 = arith.constant 0 : index
    %c0_105 = arith.constant 0 : index
    %111 = vector.load %arg3[%c0_102, %c0_103, %c0_104, %c0_105] : memref<1x2x8x128xbf16, #tpu.memory_space<vmem>>, vector<1x2x8x128xbf16>
    %112 = vector.shape_cast %111 : vector<1x2x8x128xbf16> to vector<2x8x128xbf16>
    %113 = vector.shape_cast %112 : vector<2x8x128xbf16> to vector<16x128xbf16>
    %114 = arith.extf %113 : vector<16x128xbf16> to vector<16x128xf32>
    %115 = arith.addf %110, %114 : vector<16x128xf32>
    %cst_106 = arith.constant 0.000000e+00 : f32
    %116 = vector.broadcast %cst_106 : f32 to vector<16x128xf32>
    %117 = arith.maximumf %115, %116 : vector<16x128xf32>
    %118 = vector.shape_cast %117 : vector<16x128xf32> to vector<2x8x128xf32>
    %c0_107 = arith.constant 0 : index
    %c0_108 = arith.constant 0 : index
    %c0_109 = arith.constant 0 : index
    %c0_110 = arith.constant 0 : index
    %119 = vector.load %arg11[%c0_107, %c0_108, %c0_109, %c0_110] : memref<1x2x8x128xf32, #tpu.memory_space<vmem>>, vector<1x2x8x128xf32>
    %120 = vector.shape_cast %119 : vector<1x2x8x128xf32> to vector<2x8x128xf32>
    %121 = vector.shape_cast %118 : vector<2x8x128xf32> to vector<1x2x8x128xf32>
    tpu.vector_store %arg11[%c0_107, %c0_108, %c0_109, %c0_110], %121 {strides = array<i32>} : memref<1x2x8x128xf32, #tpu.memory_space<vmem>>, vector<1x2x8x128xf32>,
    return
  }
  func.func @transform_0(%arg0: i32, %arg1: i32) -> (i32, i32, i32, i32) {
    %c2_i32 = arith.constant 2 : i32
    %0 = arith.muli %arg1, %c2_i32 : i32
    %c1_i32 = arith.constant 1 : i32
    %1 = arith.subi %0, %c1_i32 : i32
    %c0_i32 = arith.constant 0 : i32
    %2 = arith.maxsi %1, %c0_i32 : i32
    %c0_i32_0 = arith.constant 0 : i32
    %c0_i32_1 = arith.constant 0 : i32
    %c0_i32_2 = arith.constant 0 : i32
    return %arg0, %2, %c0_i32_0, %c0_i32_1 : i32, i32, i32, i32
  }
  func.func @transform_1(%arg0: i32, %arg1: i32) -> (i32, i32, i32, i32) {
    %c0_i32 = arith.constant 0 : i32
    %c0_i32_0 = arith.constant 0 : i32
    %c0_i32_1 = arith.constant 0 : i32
    return %arg0, %arg1, %c0_i32, %c0_i32_0 : i32, i32, i32, i32
  }
  func.func @transform_2(%arg0: i32, %arg1: i32) -> (i32, i32, i32, i32) {
    %c1_i32 = arith.constant 1 : i32
    %0 = arith.addi %arg1, %c1_i32 : i32
    %c2_i32 = arith.constant 2 : i32
    %1 = arith.muli %0, %c2_i32 : i32
    %c7_i32 = arith.constant 7 : i32
    %2 = arith.minsi %1, %c7_i32 : i32
    %c0_i32 = arith.constant 0 : i32
    %c0_i32_0 = arith.constant 0 : i32
    %c0_i32_1 = arith.constant 0 : i32
    return %arg0, %2, %c0_i32, %c0_i32_0 : i32, i32, i32, i32
  }
  func.func @transform_3(%arg0: i32, %arg1: i32) -> (i32, i32) {
    %c0_i32 = arith.constant 0 : i32
    %c0_i32_0 = arith.constant 0 : i32
    %c0_i32_1 = arith.constant 0 : i32
    return %c0_i32, %c0_i32_0 : i32, i32
  }
  func.func @transform_4(%arg0: i32, %arg1: i32) -> (i32, i32) {
    %c0_i32 = arith.constant 0 : i32
    %c0_i32_0 = arith.constant 0 : i32
    %c0_i32_1 = arith.constant 0 : i32
    return %c0_i32, %c0_i32_0 : i32, i32
  }
  func.func @transform_5(%arg0: i32, %arg1: i32) -> (i32, i32, i32) {
    %c0_i32 = arith.constant 0 : i32
    %c0_i32_0 = arith.constant 0 : i32
    %c0_i32_1 = arith.constant 0 : i32
    %c0_i32_2 = arith.constant 0 : i32
    return %c0_i32, %c0_i32_0, %c0_i32_1 : i32, i32, i32
  }
  func.func @transform_6(%arg0: i32, %arg1: i32) -> (i32, i32) {
    %c0_i32 = arith.constant 0 : i32
    %c0_i32_0 = arith.constant 0 : i32
    %c0_i32_1 = arith.constant 0 : i32
    return %c0_i32, %c0_i32_0 : i32, i32
  }
  func.func @transform_7(%arg0: i32, %arg1: i32) -> (i32, i32) {
    %c0_i32 = arith.constant 0 : i32
    %c0_i32_0 = arith.constant 0 : i32
    %c0_i32_1 = arith.constant 0 : i32
    return %c0_i32, %c0_i32_0 : i32, i32
  }
  func.func @transform_8(%arg0: i32, %arg1: i32) -> (i32, i32) {
    %c0_i32 = arith.constant 0 : i32
    %c0_i32_0 = arith.constant 0 : i32
    %c0_i32_1 = arith.constant 0 : i32
    return %c0_i32, %c0_i32_0 : i32, i32
  }
  func.func @transform_9(%arg0: i32, %arg1: i32) -> (i32, i32, i32, i32) {
    %c0_i32 = arith.constant 0 : i32
    %c0_i32_0 = arith.constant 0 : i32
    %c0_i32_1 = arith.constant 0 : i32
    return %arg0, %arg1, %c0_i32, %c0_i32_0 : i32, i32, i32, i32
  }
}

</mosaic_0001>

<bundles_post_ra>
// kernel: tpu_custom_call.1
= control target key start
LH: loop header
LB: loop body
LE: loop exit
PB: predicated region body
PF: predicated region fallthrough
CT: control target
= control target key end

     0   :  { %s2520_s0 = inlined_call_operand.vmem [shape: bf16[2,8,8,128], index: 0, kind: input, shape index: {}]   ;;  %s2521_s1 = inlined_call_operand.hbm [shape: bf16[2,8,8,128], index: 1, kind: input, shape index: {}]   ;;  %s2522_s2 = inlined_call_operand.hbm [shape: bf16[2,8,8,128], index: 2, kind: input, shape index: {}]   ;;  %s2523_s3 = inlined_call_operand.vmem [shape: bf16[128,32], index: 3, kind: input, shape index: {}]   ;;  %s2524_s4 = inlined_call_operand.vmem [shape: f32[1,32], index: 4, kind: input, shape index: {}]   ;;  %s2525_s5 = inlined_call_operand.hbm [shape: bf16[9,32,32], index: 5, kind: input, shape index: {}]   ;;  %s2526_s6 = inlined_call_operand.vmem [shape: f32[1,32], index: 6, kind: input, shape index: {}]   ;;  %s2527_s7 = inlined_call_operand.vmem [shape: bf16[32,128], index: 7, kind: input, shape index: {}]   ;;  %s2528_s8 = inlined_call_operand.vmem [shape: f32[1,128], index: 8, kind: input, shape index: {}]   ;;  %s2529_s9 = inlined_call_operand.hbm [shape: f32[2,8,8,128], index: 9, kind: output, shape index: {}]  }
   0x1   :  { %2543 = sst [smem:[#allocation21_spill]] %s2520_s0 }
   0x2   :  { %2544 = sst [smem:[#allocation22_spill]] %s2521_s1 }
   0x3   :  { %2545 = sst [smem:[#allocation23_spill]] %s2524_s4 }
   0x4   :  { %2546 = sst [smem:[#allocation24_spill]] %s2525_s5 }
   0x5   :  { %2547 = sst [smem:[#allocation25_spill]] %s2526_s6 }
   0x6   :  { %2548 = sst [smem:[#allocation26_spill]] %s2527_s7 }
   0x7   :  { %2549 = sst [smem:[#allocation27_spill]] %s2528_s8 }
   0x8   :  { %2550 = sst [smem:[#allocation28_spill]] %s2529_s9 }
   0x9   :  { %14 = vsyncpa [#allocation4], 0 }
   0xa   :  { %16 = vsyncpa [#allocation4 + $0x1], 0 }
   0xb   :  { %17 = vsyncpa [#allocation7], 0 }
   0xc   :  { %19 = vsyncpa [#allocation7 + $0x1], 0 }
   0xd   :  { %20 = vsyncpa [#allocation5], 0 }
   0xe   :  { %22 = vsyncpa [#allocation5 + $0x1], 0  ;;  %s2088_s30 = smov 0   ;;  %s2090_s10 = smov 0  }
   0xf   :  { %s2092_s11 = smov 0   ;;  %s2094_s12 = smov 0  }
  0x10   :  { %s2096_s13 = smov 0   ;;  %s2098_s14 = smov 0  }
  0x11   :  { %s2100_s15 = smov 0   ;;  %s2102_s16 = smov 0  }
  0x12   :  { %s2104_s17 = smov 0   ;;  %s2106_s18 = smov 0  }
  0x13   :  { %s2108_s19 = smov 0  }
  0x14 LB: > { %2551 = sst [smem:[#allocation14_spill]] %s2003_s12  ;;  %s2144_s20 = sadd.s32 4294967295, %s2031_s19   ;;  %s2031_s19 = sphi %s2108_s19, %s28_s19   ;;  %s2027_s18 = sphi %s2106_s18, %s2608_s18   ;;  %s2023_s17 = sphi %s2104_s17, %s2607_s17   ;;  %s2019_s16 = sphi %s2102_s16, %s2606_s16   ;;  %s2015_s15 = sphi %s2100_s15, %s2605_s15   ;;  %s2011_s14 = sphi %s2098_s14, %s2604_s14   ;;  %s2007_s13 = sphi %s2096_s13, %s2603_s13   ;;  %s2003_s12 = sphi %s2094_s12, %s2602_s12   ;;  %s1999_s11 = sphi %s2092_s11, %s2601_s11   ;;  %s1995_s10 = sphi %s2090_s10, %s2600_s10   ;;  %s1991_s30 = sphi %s2088_s30, %s2599_s30  }
  0x15   : > { %2552 = sst [smem:[#allocation15_spill]] %s2015_s15  ;;  %p1467_p0 = scmp.ge.s32.totalorder %s2031_s19, 1 }
  0x16   : > { %2553 = sst [smem:[#allocation16_spill]] %s2019_s16  ;;  %p99_p1 = scmp.eq.s32.totalorder %s2144_s20, 0 }
  0x17   : > { %p286_p2 = scmp.eq.s32.totalorder %s2144_s20, 7  ;;  %p299_p3 = scmp.lt.s32.totalorder %s2031_s19, 9 }
  0x18   : > { %s2554_s5 = sld [smem:[#allocation24_spill]]  ;;  %s2033_s25 = smov [#allocation8]  }
  0x19   : > { %p2153_p4 = pnand %p1467_p0, %p299_p3  ;;  %s318_s26 = sshll.u32 %s2033_s25, 4  ;;  %s319_s26 = int_to_ptr.vmem [resolvable:$true] %s318_s26 }
  0x1a   : > { %s2532_s27 = smov 64   ;;  %s2533_s28 = smov 4  }
  0x1b   : > { %p1696_p5 = pneg %p2153_p4  ;;  %s1460_s29 = sadd.s32 4294967294, %s2031_s19  }
  0x1c   : > { %s2531_s21 = sadd.s32 1, %s2023_s17  ;;  %p92_p8 = scmp.ne.s32.totalorder %s2011_s14, %s2007_s13 }
  0x1d   : > { %p1697_p6 = pnand %p1696_p5, %p99_p1  ;;  %p2168_p7 = scmp.ge.s32.totalorder %s2531_s21, 4 }
  0x1e   : > { %s316_s23 = sshll.u32 %s2554_s5, 4  ;;  %p93_p9 = scmp.eq.s32.totalorder %s2031_s19, 0  ;;  %s317_s23 = int_to_ptr.hbm [resolvable:$true] %s316_s23 }
  0x1f   : > { %1699 = dma.hbm_to_vmem [thread:$0]  (!%p1697_p6), %s317_s23, 2304, %s319_s26, [#allocation7], %s2532_s27, %s2532_s27, %s2533_s28  }
  0x20   : > { %p98_p10 = scmp.ne.s32.totalorder %s2007_s13, %s2003_s12  ;;  %s1642_s9 = sshll.u32 %s2023_s17, 1 }
  0x21   : > { %p2182_p11 = por %p286_p2, %p92_p8  ;;  %p2188_p12 = por %p93_p9, %p92_p8 }
  0x22   : > { %p2194_p13 = por %p99_p1, %p98_p10  ;;  %p292_p0 = scmp.eq.s32.totalorder %s1460_s29, 7 }
  0x23   : > { %s2557_s8 = scalar_select %p2182_p11, 1, 0 }
  0x24   : > { %p1712_p3 = scmp.lt.s32.totalorder %s2031_s19, 8  ;;  %s360_s5 = sand.u32 1, %s2011_s14  }
  0x25   : > { %2558 = sst [smem:[#allocation17_spill]] %s2557_s8  ;;  %s1472_s25 = sshll.u32 %s2027_s18, 3 }
  0x26   : > { %p2201_p2 = por %p292_p0, %p98_p10  ;;  %s1470_s27 = sshll.u32 %s360_s5, 3 }
  0x27   : > { %s369_s28 = sadd.s32 %s1642_s9, %s1472_s25  ;;  %s2563_s1 = sld [smem:[#allocation22_spill]] }
  0x28   : > { %s2561_s21 = scalar_select %p2201_p2, 1, 0 }
  0x29   : > { %s1473_s12 = sshll.u32 %s369_s28, 2  ;;  %s364_s7 = scalar_lea.vmem [#allocation3], %s1470_s27 }
  0x2a   : > { %2562 = sst [smem:[#allocation18_spill]] %s2561_s21  ;;  %s374_s4 = sshll.u32 %s364_s7, 4  ;;  %s375_s4 = int_to_ptr.vmem [resolvable:$true] %s374_s4 }
  0x2b   : > { %p1701_p5 = pnand %p1712_p3, %p2188_p12  ;;  %s361_s21 = scalar_lea.sflag [#allocation4], %s360_s5 }
  0x2c   : > { %s2564_s16 = smov 4   ;;  %s2565_s15 = smov 64  }
  0x2d   : > { %s371_s29 = scalar_lea.hbm %s2563_s1, %s1473_s12  ;;  %s1643_s28 = sadd.s32 2, %s1642_s9 }
  0x2e   : > { %s372_s0 = sshll.u32 %s371_s29, 4  ;;  %s2566_s6 = sadd.s32 1, %s2023_s17  ;;  %s373_s0 = int_to_ptr.hbm [resolvable:$true] %s372_s0 }
  0x2f   : > { %1703 = dma.hbm_to_vmem [thread:$0]  (!%p1701_p5), %s373_s0, 128, %s375_s4, %s361_s21, %s2565_s15, %s2565_s15, %s2564_s16  }
  0x30   : > { %s2610_s6 = smov (%p2168_p7, %s2566_s6), 0  ;;  %s2568_s7 = sadd.s32 1, %s2027_s18 }
  0x31   : > { %2567 = sst [smem:[#allocation19_spill]] %s2610_s6  ;;  %s2612_s7 = smov (!%p2168_p7, %s2568_s7), %s2027_s18 }
  0x32   : > { %s81_s5 = ssub.s32 %s2023_s17, %s2610_s6  ;;  %p110_p6 = scmp.lt.s32.totalorder %s1643_s28, 7 }
  0x33   : > { %p42_p8 = scmp.ge.s32.totalorder %s2612_s7, 2  ;;  %s1644_s8 = sshll.u32 %s2610_s6, 1 }
  0x34   : > { %s2614_s28 = smov (!%p110_p6, %s1643_s28), 7  ;;  %s1645_s0 = sadd.s32 2, %s1644_s8 }
  0x35   : > { %s2616_s7 = smov (%p42_p8, %s2612_s7), 0  ;;  %s121_s4 = sadd.s32 1, %s1999_s11 }
  0x36   : > { %2569 = sst [smem:[#allocation20_spill]] %s2616_s7  ;;  %s80_s9 = ssub.s32 %s2027_s18, %s2616_s7 }
  0x37   : > { %p114_p10 = scmp.lt.s32.totalorder %s1645_s0, 7  ;;  %s82_s12 = sor.u32 %s81_s5, %s80_s9 }
  0x38   : > { %p128_p7 = scmp.ne.s32.totalorder %s1999_s11, %s1995_s10  ;;  %p83_p12 = scmp.eq.s32.totalorder %s82_s12, 0 }
  0x39   : > { %p134_p0 = scmp.ne.s32.totalorder %s1995_s10, %s1991_s30  ;;  %s2618_s0 = smov (!%p114_p10, %s1645_s0), 7 }
  0x3a   : > { %s2570_s15 = sadd.s32 1, %s2011_s14  ;;  %s117_s27 = ssub.s32 %s2614_s28, %s2618_s0 }
  0x3b   : > { %s2243_s16 = scalar_select %p83_p12, %s2011_s14, %s2570_s15  }
  0x3c   : > { %p2247_p5 = por %p128_p7, %p93_p9  ;;  %s118_s22 = sor.u32 %s117_s27, %s80_s9 }
  0x3d   : > { %p2253_p6 = por %p134_p0, %p99_p1  ;;  %p119_p8 = scmp.eq.s32.totalorder %s118_s22, 0 }
  0x3e   : > { %s384_s30 = sand.u32 1, %s2031_s19   ;;  %s386_s29 = sand.u32 1, %s1999_s11  }
  0x3f   : > { %s2260_s5 = scalar_select %p119_p8, %s1999_s11, %s121_s4  }
  0x40   : > { %s1474_s8 = sshll.u32 %s386_s29, 2  ;;  %s396_s0 = sadd.s32 %s1472_s25, %s2614_s28 }
  0x41   : > { %s1477_s12 = sshll.u32 %s396_s0, 2  ;;  %s388_s6 = scalar_lea.vmem [#allocation6], %s1474_s8 }
  0x42   : > { %s398_s7 = scalar_lea.hbm %s2522_s2, %s1477_s12  ;;  %s402_s9 = sshll.u32 %s388_s6, 4  ;;  %s403_s9 = int_to_ptr.vmem [resolvable:$true] %s402_s9 }
  0x43   : > { %s400_s27 = sshll.u32 %s398_s7, 4  ;;  %p1704_p9 = pnand %p1712_p3, %p2247_p5  ;;  %s401_s27 = int_to_ptr.hbm [resolvable:$true] %s400_s27 }
  0x44   : > { %s385_s22 = scalar_lea.sflag [#allocation7], %s384_s30  ;;  %411 = sbr.rel (%p2153_p4) target bundleno = 624 (0x270), region = 56 }
  0x45   : > { %1706 = dma.hbm_to_vmem [thread:$0]  (!%p1704_p9), %s401_s27, 64, %s403_s9, %s385_s22  }
  0x46   : > { %s2274_s25 = sand.u32 (!%p2153_p4), 1, %s2007_s13  }
  0x47   : > { %s1479_s1 = sshll.u32 (!%p2153_p4), %s2274_s25, 3  ;;  %s414_s28 = scalar_lea.sflag (!%p2153_p4), [#allocation4], %s2274_s25 }
  0x48   : > { %s2278_s6 = scalar_lea.vmem (!%p2153_p4), [#allocation3], %s1479_s1 }
  0x49   : > { %1974 = dma.done.wait (%p2194_p13), %s414_s28, 128  }
  0x4a   : > { %1976 = vsyncadd (%p2194_p13), %s414_s28, 4294967168  ;;  %s423_s24 = sand.u32 1, %s2144_s20   ;;  %s425_s7 = sand.u32 1, %s1995_s10  }
  0x4b   : > { %s2286_s4 = sshll.u32 %s425_s7, 2  ;;  %s424_s21 = scalar_lea.sflag [#allocation7], %s423_s24 }
  0x4c   : > { %s427_s30 = scalar_lea.vmem [#allocation6], %s2286_s4 }
  0x4d   : > { %1978 = dma.done.wait (%p2253_p6), %s424_s21, 64  }
  0x4e   : > { %1980 = vsyncadd (%p2253_p6), %s424_s21, 4294967232 }
  0x4f   : > { %1982 = dma.done.wait (%p99_p1), [#allocation7], 2304  }
  0x50   : > { %1984 = vsyncadd (%p99_p1), [#allocation7], 4294964992  ;;  %s2573_s8 = sld [smem:[#allocation15_spill]]  ;;  %v1657_v0 = vld [vmem:[%s2523_s3 + $0x38] sm:$0xff]  ;;  %v1656_v1 = vld [vmem:[%s2523_s3 + $0x30] sm:$0xff]  ;;  %vm525_vm0 = vcmask 253952  }
  0x51   : > { %613 = vmatpush.bf16.msra.mxu0 %v1657_v0  ;;  %667 = vmatpush.bf16.msra.mxu1 %v1657_v0  ;;  %vm526_vm1 = vsmask.f32 256  ;;  %v1655_v2 = vld [vmem:[%s2523_s3 + $0x28] sm:$0xff]  ;;  %vm540_vm3 = vsmask.f32 7938  ;;  %s2578_s27 = sld [smem:[#allocation16_spill]] }
  0x52   : > { %704 = vmatpush.bf16.msra.mxu2 %v1657_v0  ;;  %vm2307_vm2 = vmand %vm525_vm0, %vm526_vm1  ;;  %v531_v4 = vld [vmem:[#allocation2 + $0x8] sm:$0x1]  ;;  %v542_v7 = vld [vmem:[#allocation2 + $0x4] sm:$0x1]  ;;  %s2580_s26 = sld [smem:[#allocation23_spill]]  ;;  %vm652_vm6 = vcmask 257024  }
  0x53   : > { %v532_v5 = vsel %vm2307_vm2, 0, %v531_v4  ;;  %vm2318_vm4 = vmand %vm525_vm0, %vm540_vm3  ;;  %v545_v8 = vld [vmem:[#allocation2 + $0xc] sm:$0x1]  ;;  %v548_v11 = vld [vmem:[#allocation2 + $0x14] sm:$0x1]  ;;  %vm858_vm10 = vcmask 1042432  }
  0x54   : > { %533 = vst [vmem:[#allocation2 + $0x8] sm:$0x1] %v532_v5  ;;  %v543_v9 = vsel %vm2318_vm4, 0, %v542_v7  ;;  %v546_v10 = vsel %vm2318_vm4, 0, %v545_v8  ;;  %v549_v12 = vsel %vm2318_vm4, 0, %v548_v11  ;;  %v1654_v15 = vld [vmem:[%s2523_s3 + $0x20] sm:$0xff]  ;;  %vm2372_vm8 = vmand %vm652_vm6, %vm540_vm3 }
  0x55   : > { %614 = vmatpush.bf16.msra.mxu0 %v1656_v1  ;;  %668 = vmatpush.bf16.msra.mxu1 %v1656_v1  ;;  %544 = vst [vmem:[#allocation2 + $0x4] sm:$0x1] %v543_v9  ;;  %v551_v13 = vld [vmem:[#allocation2 + $0x1c] sm:$0x1]  ;;  %v1652_v17 = vld [vmem:[%s2523_s3 + $0x10] sm:$0xff]  ;;  %v1651_v18 = vld [vmem:[%s2523_s3 + $0x8] sm:$0xff] }
  0x56   : > { %s1483_s23 = sshll.u32 %s2573_s8, 1  ;;  %705 = vmatpush.bf16.msra.mxu2 %v1656_v1  ;;  %547 = vst [vmem:[#allocation2 + $0xc] sm:$0x1] %v546_v10  ;;  %v552_v14 = vsel %vm2318_vm4, 0, %v551_v13  ;;  %v1653_v16 = vld [vmem:[%s2523_s3 + $0x18] sm:$0xff]  ;;  %v1650_v19 = vld [vmem:[%s2523_s3] sm:$0xff] }
  0x57   : > { %s2313_s20 = sadd.s32 4294967295, %s1483_s23  ;;  %550 = vst [vmem:[#allocation2 + $0x14] sm:$0x1] %v549_v12  ;;  %p489_p4 = scmp.lt.s32.totalorder %s2578_s27, 1  ;;  %v1658_v20 = vld [vmem:[%s2278_s6] sm:$0xff]  ;;  %v1668_v29 = vld [vmem:[#allocation8 + $0x38] sm:$0xff] }
  0x58   : > { %p487_p1 = scmp.gt.s32.totalorder %s2313_s20, 0  ;;  %553 = vst [vmem:[#allocation2 + $0x1c] sm:$0x1] %v552_v14  ;;  %p1485_p13 = scmp.lt.s32.totalorder %s2313_s20, 7  ;;  %v703_v22 = vld [vmem:[%s427_s30] sm:$0xf] }
  0x59   : > { %615 = vmatpush.bf16.msra.mxu0 %v1655_v2  ;;  %669 = vmatpush.bf16.msra.mxu1 %v1655_v2  ;;  %s490_s7 = scalar_select %p489_p4, %s2578_s27, 1  ;;  %v528_v23 = vld [vmem:[#allocation2] sm:$0x1]  ;;  %v537_v25 = vld [vmem:[#allocation2 + $0x18] sm:$0x1]  ;;  %v1663_v30 = vld [vmem:[#allocation8 + $0x18] sm:$0xff] }
  0x5a   : > { %706 = vmatpush.bf16.msra.mxu2 %v1655_v2  ;;  %s2620_s20 = smov (!%p487_p1, %s2313_s20), 0  ;;  %v529_v24 = vsel %vm2307_vm2, 0, %v528_v23  ;;  %v534_v26 = vld [vmem:[#allocation2 + $0x10] sm:$0x1]  ;;  %v538_v27 = vsel %vm2307_vm2, 0, %v537_v25  ;;  %p681_p3 = scmp.gt.s32.totalorder %s2573_s8, 0  ;;  %810 = vmatpush.bf16.msra.mxu3 %v1663_v30 }
  0x5b   : > { %s2622_s20 = smov (!%p1485_p13, %s2620_s20), 7  ;;  %s1490_s29 = sshll.u32 %s490_s7, 3  ;;  %530 = vst [vmem:[#allocation2] sm:$0x1] %v529_v24  ;;  %v535_v28 = vsel %vm2307_vm2, 0, %v534_v26  ;;  %v1672_v31 = vld [vmem:[#allocation8 + $0x58] sm:$0xff] }
  0x5c   : > { %s494_s0 = sadd.s32 %s2622_s20, %s1490_s29  ;;  %s2579_s7 = sld [smem:[#allocation21_spill]]  ;;  %539 = vst [vmem:[#allocation2 + $0x18] sm:$0x1] %v538_v27  ;;  %v1667_v32 = vld [vmem:[#allocation8 + $0x30] sm:$0xff]  ;;  %v1808_v33 = vld [vmem:[%s2580_s26] ss:$0 sm:$0xff] }
  0x5d   : > { %616 = vmatpush.bf16.msra.mxu0 %v1654_v15  ;;  %670 = vmatpush.bf16.msra.mxu1 %v1654_v15  ;;  %s1491_s9 = sshll.u32 %s494_s0, 2  ;;  %536 = vst [vmem:[#allocation2 + $0x10] sm:$0x1] %v535_v28  ;;  %p718_p10 = scmp.lt.s32.totalorder %s2573_s8, 3  ;;  %v1662_v39 = vld [vmem:[#allocation8 + $0x10] sm:$0xff]  ;;  %v1661_v45 = vld [vmem:[#allocation8 + $0x8] sm:$0xff] }
  0x5e   : > { %707 = vmatpush.bf16.msra.mxu2 %v1654_v15  ;;  %s682_s4 = scalar_select %p681_p3, 1, 0  ;;  %v1671_v40 = vld [vmem:[#allocation8 + $0x50] sm:$0xff]  ;;  %811 = vmatpush.bf16.msra.mxu3 %v1662_v39  ;;  %v1670_v46 = vld [vmem:[#allocation8 + $0x48] sm:$0xff]  ;;  %v1669_v56 = vld [vmem:[#allocation8 + $0x40] sm:$0xff]  ;;  %vm859_vm11 = vcmask 1046532  }
  0x5f   : > { %s719_s29 = scalar_select %p718_p10, 1, 0  ;;  %v1677_v57 = vld [vmem:[#allocation8 + $0x78] sm:$0xff]  ;;  %v654_v59 = vld [vmem:[#allocation2 + $0x8] sm:$0xf]  ;;  %vm2402_vm13 = vmor %vm858_vm10, %vm859_vm11  ;;  %vm800_vm14 = vcmask 261120  }
  0x60   : > { %v683_v34 = vstv %s682_s4  ;;  %v657_v63 = vld [vmem:[#allocation2 + $0xc] sm:$0x1]  ;;  %v700_v7 = vld [vmem:[#allocation2 + $0x4] sm:$0x1]  ;;  %v738_v28 = vld [vmem:[#allocation2 + $0x1c] sm:$0x1] }
  0x61   : > { %617 = vmatpush.bf16.msra.mxu0 %v1653_v16  ;;  %671 = vmatpush.bf16.msra.mxu1 %v1653_v16  ;;  %vm684_vm5 = vcmp.eq.s32.totalorder %v683_v34, 1  ;;  %v720_v48 = vstv %s719_s29  ;;  %v1676_v23 = vld [vmem:[#allocation8 + $0x70] sm:$0xff]  ;;  %v663_v34 = vld [vmem:[#allocation2 + $0x14] sm:$0x1]  ;;  %vm749_vm9 = vsmask.f32 3328 }
  0x62   : > { %708 = vmatpush.bf16.msra.mxu2 %v1653_v16  ;;  %s496_s20 = scalar_lea.vmem %s2579_s7, %s1491_s9  ;;  %844 = vmatpush.bf16.msrb.mxu3 %v1661_v45  ;;  %vm2367_vm7 = vcmp.eq.s32.totalorder %v720_v48, 1  ;;  %v697_v6 = vld [vmem:[#allocation2] sm:$0xf]  ;;  %vm750_vm12 = vsmask.f32 7440  ;;  %s2589_s15 = sld [smem:[#allocation26_spill]] }
  0x63   : > { %v666_v21 = vld [vmem:[%s496_s20] sm:$0xf]  ;;  %v735_v27 = vld [vmem:[#allocation2 + $0x18] sm:$0xf]  ;;  %vm2408_vm15 = vmor %vm749_vm9, %vm750_vm12  ;;  %s2591_s7 = sld [smem:[#allocation25_spill]]  ;;  %s1638_s20 = sshll.u32 %s2578_s27, 3 }
  0x64   : > { %s2592_s21 = sld [smem:[#allocation27_spill]]  ;;  %s1311_s26 = sadd.s32 %s1638_s20, %s1483_s23 }
  0x65   : > { %618 = vmatpush.bf16.msra.mxu0 %v1652_v17  ;;  %672 = vmatpush.bf16.msra.mxu1 %v1652_v17  ;;  %s1482_s29 = sshll.u32 %s2274_s25, 4  ;;  %s1639_s0 = sshll.u32 %s1311_s26, 3 }
  0x66   : > { %709 = vmatpush.bf16.msra.mxu2 %v1652_v17  ;;  %s2593_s22 = sld [smem:[#allocation28_spill]]  ;;  %s484_s27 = scalar_lea.vmem [#allocation9], %s1482_s29 }
  0x67   : > { %s1314_s8 = sshll.u32 %s484_s27, 4  ;;  %s1300_s23 = scalar_lea.sflag [#allocation5], %s2274_s25  ;;  %s1315_s8 = int_to_ptr.vmem [resolvable:$true] %s1314_s8 }
  0x68   : > { %s2590_s9 = smov %s2589_s15 }
  0x69   : > { %619 = vmatpush.bf16.msra.mxu0 %v1651_v18  ;;  %673 = vmatpush.bf16.msra.mxu1 %v1651_v18 }
  0x6a   : > { %710 = vmatpush.bf16.msra.mxu2 %v1651_v18 }
  0x6c   : > { %s1313_s1 = scalar_lea.hbm %s2593_s22, %s1639_s0  ;;  %s1921_s30 = scalar_lea.hbm %s2593_s22, 128 }
  0x6d   : > { %620 = vmatpush.bf16.msra.mxu0 %v1650_v19  ;;  %674 = vmatpush.bf16.msra.mxu1 %v1650_v19  ;;  %s1316_s28 = sshll.u32 %s1313_s1, 4  ;;  %s1317_s28 = int_to_ptr.hbm [resolvable:$true] %s1316_s28 }
  0x6e   : > { %711 = vmatpush.bf16.msra.mxu2 %v1650_v19  ;;  %s1915_s24 = sshra.s32 %s1317_s28, 4  ;;  %s1916_s24 = int_to_ptr.hbm [resolvable:$true] %s1915_s24 }
  0x6f   : > { %p1922_p5 = scmp.lt.s32.totalorder %s1916_s24, %s2593_s22 }
  0x70   : > { %621 = vmatmul.bf16.vlgmr.msra.gmra.mxu0 %v1658_v20  ;;  %675 = vmatmul.bf16.vlgmr.msra.gmra.mxu1 %v666_v21 }
  0x71   : > { %712 = vmatmul.bf16.vlgmr.msra.gmra.mxu2 %v703_v22  ;;  %941 = vmatpush.bf16.msrb.mxu0 %v1668_v29  ;;  %v1660_v22 = vld [vmem:[#allocation8] sm:$0xff]  ;;  %v660_v29 = vld [vmem:[#allocation2 + $0x10] sm:$0xf] }
  0x72   : > { %1065 = vmatpush.bf16.msrb.mxu2 %v1672_v31  ;;  %1012 = vmatpush.bf16.msrb.mxu1 %v1670_v46 }
  0x73   : > { %845 = vmatpush.bf16.msrb.mxu3 %v1660_v22 }
  0x75   : > { %942 = vmatpush.bf16.msrb.mxu0 %v1667_v32 }
  0x76   : > { %1066 = vmatpush.bf16.msrb.mxu2 %v1671_v40  ;;  %1013 = vmatpush.bf16.msrb.mxu1 %v1669_v56 }
  0x79   : > { %1180 = vmatpush.bf16.msra.mxu0 %v1677_v57 }
  0x7d   : > { %1181 = vmatpush.bf16.msra.mxu0 %v1676_v23 }
  0xed   : > { %v622_v35 = vpop.f32.mrf.mxu0  ;;  %v676_v36 = vpop.f32.mrf.mxu1 }
  0xee   : > { %v623_v37 = vadd.f32 %v1808_v33, %v622_v35  ;;  %v677_v38 = vadd.f32 %v1808_v33, %v676_v36 }
  0xf0   : > { %v627_v41 = vmax.f32 %v623_v37, 0.0  ;;  %v680_v42 = vmax.f32 %v677_v38, 0.0 }
  0xf2   : > { %v629_v43 = vpack.c.bf16 %v627_v41, %v627_v41  ;;  %v685_v44 = vsel %vm684_vm5, %v680_v42, 0.0 }
  0xf3   : > { %v686_v47 = vpack.c.bf16 %v685_v44, %v685_v44 }
  0xf4   : > { %v632_v49 = vshrl.u32 %v629_v43, 16  ;;  %v635_v50 = vshll.u32 %v629_v43, 16  ;;  %v713_v51 = vpop.f32.mrf.mxu2 }
  0xf5   : > { %v688_v52 = vshrl.u32 %v686_v47, 16  ;;  %v714_v53 = vadd.f32 %v1808_v33, %v713_v51  ;;  %v624_v54 = vpop.f32.mrf.mxu0  ;;  %v678_v55 = vpop.f32.mrf.mxu1  ;;  %v691_v1 = vshll.u32 %v686_v47, 16 }
  0xf6   : > { %v634_v58 = vrot.slane %v632_v49, 7  ;;  %v625_v61 = vadd.f32 %v1808_v33, %v624_v54  ;;  %v1681_v55 = vld [vmem:[%s2589_s15 + $0x8] sm:$0xff] }
  0xf7   : > { %v690_v0 = vrot.slane %v688_v52, 7  ;;  %v717_v2 = vmax.f32 %v714_v53, 0.0  ;;  %1281 = vmatpush.bf16.msra.mxu2 %v1681_v55 }
  0xf8   : > { %v637_v4 = vor.u32 %v635_v50, %v634_v58  ;;  %v638_v5 = vrot.slane %v634_v58, 4  ;;  %v628_v8 = vmax.f32 %v625_v61, 0.0 }
  0xf9   : > { %v693_v9 = vor.u32 %v691_v1, %v690_v0  ;;  %v694_v10 = vrot.slane %v690_v0, 4  ;;  %v722_v11 = vsel %vm2367_vm7, %v717_v2, 0.0 }
  0xfa   : > { %v655_v12 = vsel %vm2372_vm8, %v637_v4, %v654_v59  ;;  %v658_v13 = vsel %vm2307_vm2, %v638_v5, %v657_v63  ;;  %v723_v14 = vpack.c.bf16 %v722_v11, %v722_v11  ;;  %v630_v15 = vpack.c.bf16 %v628_v8, %v628_v8  ;;  %v1679_v4 = vld [vmem:[#allocation8 + $0x88] sm:$0xff] }
  0xfb   : > { %656 = vst [vmem:[#allocation2 + $0x8] sm:$0xf] %v655_v12  ;;  %v698_v16 = vsel %vm2372_vm8, %v693_v9, %v697_v6  ;;  %v701_v17 = vsel %vm2307_vm2, %v694_v10, %v700_v7  ;;  %v1678_v9 = vld [vmem:[#allocation8 + $0x80] sm:$0xff]  ;;  %1233 = vmatpush.bf16.msra.mxu1 %v1679_v4 }
  0xfc   : > { %659 = vst [vmem:[#allocation2 + $0xc] sm:$0x1] %v658_v13  ;;  %v725_v18 = vshrl.u32 %v723_v14, 16  ;;  %v728_v19 = vshll.u32 %v723_v14, 16  ;;  %v640_v20 = vshrl.u32 %v630_v15, 16  ;;  %v715_v21 = vpop.f32.mrf.mxu2  ;;  %v643_v26 = vshll.u32 %v630_v15, 16 }
  0xfd   : > { %699 = vst [vmem:[#allocation2] sm:$0xf] %v698_v16 }
  0xfe   : > { %702 = vst [vmem:[#allocation2 + $0x4] sm:$0x1] %v701_v17  ;;  %v727_v24 = vrot.slane %v725_v18, 7  ;;  %v642_v25 = vrot.slane %v640_v20, 7 }
  0xff   : > { %1234 = vmatpush.bf16.msra.mxu1 %v1678_v9 }
 0x100   : > { %v730_v30 = vor.u32 %v728_v19, %v727_v24  ;;  %v731_v31 = vrot.slane %v727_v24, 4  ;;  %v645_v32 = vor.u32 %v643_v26, %v642_v25  ;;  %v646_v33 = vrot.slane %v642_v25, 4 }
 0x102   : > { %v736_v35 = vsel %vm2372_vm8, %v730_v30, %v735_v27  ;;  %v739_v36 = vsel %vm2307_vm2, %v731_v31, %v738_v28  ;;  %v661_v37 = vsel %vm2372_vm8, %v645_v32, %v660_v29  ;;  %v742_v38 = vld [vmem:[#allocation2 + $0x8] sm:$0xf]  ;;  %v664_v39 = vsel %vm2307_vm2, %v646_v33, %v663_v34  ;;  %v1665_v31 = vld [vmem:[#allocation8 + $0x28] sm:$0xff] }
 0x103   : > { %737 = vst [vmem:[#allocation2 + $0x18] sm:$0xf] %v736_v35  ;;  %v2394_v40 = vld [vmem:[#allocation2 + $0xc] sm:$0x1]  ;;  %v767_v41 = vshrl.u32 %v742_v38, 16  ;;  %v770_v42 = vshll.u32 %v742_v38, 16 }
 0x104   : > { %740 = vst [vmem:[#allocation2 + $0x1c] sm:$0x1] %v739_v36  ;;  %v741_v43 = vld [vmem:[#allocation2] sm:$0xf]  ;;  %v1022_v44 = vld [vmem:[#allocation2 + $0x8] sm:$0xe] }
 0x105   : > { %662 = vst [vmem:[#allocation2 + $0x10] sm:$0xf] %v661_v37  ;;  %v2396_v45 = vld [vmem:[#allocation2 + $0x4] sm:$0x1]  ;;  %v753_v46 = vshrl.u32 %v741_v43, 16  ;;  %v756_v47 = vshll.u32 %v741_v43, 16 }
 0x106   : > { %665 = vst [vmem:[#allocation2 + $0x14] sm:$0x1] %v664_v39  ;;  %v762_v48 = vshll.u32 %v2396_v45, 16  ;;  %v769_v49 = vrot.slane %v767_v41, 4  ;;  %v772_v50 = vrot.slane %v770_v42, 5  ;;  %v776_v3 = vshll.u32 %v2394_v40, 16 }
 0x107   : > { %v755_v51 = vrot.slane %v753_v46, 4  ;;  %v758_v52 = vrot.slane %v756_v47, 5  ;;  %v952_v53 = vld [vmem:[#allocation2 + $0xc] sm:$0x1]  ;;  %v1583_v56 = vrot.slane %v1022_v44, 9 }
 0x108   : > { %v773_v54 = vor.u32 %v772_v50, %v769_v49  ;;  %v1030_v57 = vrot.slane %v952_v53, 5  ;;  %v951_v58 = vld [vmem:[#allocation2 + $0x8] sm:$0xf]  ;;  %v764_v0 = vrot.slane %v762_v48, 5  ;;  %v778_v2 = vrot.slane %v776_v3, 5  ;;  %v1664_v50 = vld [vmem:[#allocation8 + $0x20] sm:$0xff] }
 0x109   : > { %v759_v60 = vor.u32 %v758_v52, %v755_v51  ;;  %v956_v61 = vshrl.u32 %v951_v58, 16  ;;  %v959_v62 = vshll.u32 %v951_v58, 16  ;;  %v1563_v63 = vld [vmem:[#allocation2 + $0x8] sm:$0xf]  ;;  %v965_v8 = vshll.u32 %v952_v53, 16 }
 0x10a   : > { %v774_v1 = vrot.slane %v773_v54, 4  ;;  %v1031_v13 = vsel %vm2402_vm13, %v1583_v56, %v1030_v57  ;;  %v1121_v25 = vld [vmem:[#allocation2 + $0x18] sm:$0xf]  ;;  %v852_v59 = vld [vmem:[#allocation2] sm:$0xe] }
 0x10b   : > { %v760_v5 = vrot.slane %v759_v60, 4  ;;  %v958_v6 = vrot.slane %v956_v61, 4  ;;  %v961_v7 = vrot.slane %v959_v62, 5  ;;  %v1041_v26 = vunpack.c.l.b16 %v1031_v13  ;;  %v1122_v48 = vld [vmem:[#allocation2 + $0x1c] sm:$0x1] }
 0x10c   : > { %v1666_v10 = vld [vmem:[#allocation2 + $0xc] sm:$0xf0]  ;;  %v779_v11 = vsel %vm2408_vm15, %v774_v1, %v778_v2  ;;  %v1138_v43 = vshrl.u32 %v1121_v25, 16  ;;  %v967_v46 = vrot.slane %v965_v8, 5  ;;  %v1141_v49 = vshll.u32 %v1121_v25, 16 }
 0x10d   : > { %v1023_v12 = vld [vmem:[#allocation2 + $0x10] sm:$0xe]  ;;  %v1564_v15 = vor.u32 %v1666_v10, %v1563_v63  ;;  %v765_v16 = vsel %vm2408_vm15, %v760_v5, %v764_v0  ;;  %v786_v17 = vunpack.c.l.b16 %v779_v11  ;;  %v954_v18 = vld [vmem:[#allocation2 + $0x14] sm:$0x1]  ;;  %v962_v23 = vor.u32 %v961_v7, %v958_v6  ;;  %v1191_v10 = vld [vmem:[#allocation2 + $0x18] sm:$0xe] }
 0x10e   : > { %v953_v14 = vld [vmem:[#allocation2 + $0x10] sm:$0xf]  ;;  %v1584_v19 = vrot.slane %v1023_v12, 9  ;;  %v785_v21 = vunpack.c.l.b16 %v765_v16  ;;  %v1034_v22 = vrot.slane %v954_v18, 5  ;;  %v2419_v28 = vld [vmem:[#allocation2 + $0x14] sm:$0x1] }
 0x10f   : > { %v1119_v20 = vld [vmem:[#allocation2 + $0x10] sm:$0xf]  ;;  %v970_v24 = vshrl.u32 %v953_v14, 16  ;;  %1573 = vmatmul.msk.bf16.vlgmr.msrb.gmra.mxu0 %vm800_vm14, %v1564_v15  ;;  %v973_v27 = vshll.u32 %v953_v14, 16  ;;  %v979_v35 = vshll.u32 %v954_v18, 16  ;;  %v963_v37 = vrot.slane %v962_v23, 4 }
 0x110   : > { %v1124_v29 = vshrl.u32 %v1119_v20, 16  ;;  %v1127_v30 = vshll.u32 %v1119_v20, 16  ;;  %v787_v32 = vpack.c.b16 %v786_v17, %v785_v21  ;;  %v1035_v33 = vsel %vm2402_vm13, %v1584_v19, %v1034_v22  ;;  %v1190_v9 = vld [vmem:[#allocation2 + $0x10] sm:$0xe]  ;;  %v1539_v11 = vld [vmem:[#allocation2] sm:$0xf] }
 0x111   : > { %v972_v34 = vrot.slane %v970_v24, 4  ;;  %v1042_v36 = vunpack.c.l.b16 %v1035_v33  ;;  %v975_v38 = vrot.slane %v973_v27, 5  ;;  %v1133_v42 = vshll.u32 %v2419_v28, 16  ;;  %v1659_v12 = vld [vmem:[#allocation2 + $0x4] sm:$0xf0]  ;;  %v1675_v18 = vld [vmem:[#allocation8 + $0x68] sm:$0xff] }
 0x112   : > { %v1126_v39 = vrot.slane %v1124_v29, 4  ;;  %1536 = vmatmul.msk.bf16.vlgmr.msra.gmra.mxu3 %vm800_vm14, %v787_v32  ;;  %v1129_v41 = vrot.slane %v1127_v30, 5  ;;  %v1140_v51 = vrot.slane %v1138_v43, 4  ;;  %v1147_v52 = vshll.u32 %v1122_v48, 16  ;;  %v853_v20 = vld [vmem:[#allocation2 + $0x8] sm:$0xe] }
 0x113   : > { %v1043_v44 = vpack.c.b16 %v1042_v36, %v1041_v26  ;;  %v976_v47 = vor.u32 %v975_v38, %v972_v34  ;;  %898 = vmatpush.bf16.msra.mxu3 %v1665_v31  ;;  %v968_v53 = vsel %vm2408_vm15, %v963_v37, %v967_v46  ;;  %v981_v56 = vrot.slane %v979_v35, 5  ;;  %v1674_v23 = vld [vmem:[#allocation8 + $0x60] sm:$0xff] }
 0x114   : > { %v1130_v3 = vor.u32 %v1129_v41, %v1126_v39  ;;  %v1143_v57 = vrot.slane %v1141_v49, 5  ;;  %v1135_v60 = vrot.slane %v1133_v42, 5  ;;  %v1149_v63 = vrot.slane %v1147_v52, 5 }
 0x115   : > { %1593 = vmatmul.msk.bf16.vlgmr.msrb.gmra.mxu2 %vm800_vm14, %v1043_v44  ;;  %v977_v54 = vrot.slane %v976_v47, 4  ;;  %v988_v0 = vunpack.c.l.b16 %v968_v53  ;;  %v1616_v14 = vrot.slane %v1190_v9, 9  ;;  %v1198_v15 = vrot.slane %v2419_v28, 5 }
 0x116   : > { %v1131_v58 = vrot.slane %v1130_v3, 4  ;;  %v1144_v62 = vor.u32 %v1143_v57, %v1140_v51  ;;  %v1617_v16 = vrot.slane %v1191_v10, 9  ;;  %v1202_v17 = vrot.slane %v1122_v48, 5  ;;  %v1680_v48 = vld [vmem:[%s2590_s9] sm:$0xff] }
 0x117   : > { %v982_v61 = vsel %vm2408_vm15, %v977_v54, %v981_v56  ;;  %899 = vmatpush.bf16.msra.mxu3 %v1664_v50  ;;  %v1540_v19 = vor.u32 %v1659_v12, %v1539_v11  ;;  %v1199_v21 = vsel %vm2402_vm13, %v1616_v14, %v1198_v15  ;;  %v863_v24 = vrot.slane %v2396_v45, 5  ;;  %v1673_v45 = vld [vmem:[#allocation2 + $0x14] sm:$0xf0]  ;;  %1282 = vmatpush.bf16.msra.mxu2 %v1680_v48 }
 0x118   : > { %v989_v1 = vunpack.c.l.b16 %v982_v61  ;;  %v1136_v2 = vsel %vm2408_vm15, %v1131_v58, %v1135_v60  ;;  %v1145_v4 = vrot.slane %v1144_v62, 4  ;;  %v1203_v22 = vsel %vm2402_vm13, %v1617_v16, %v1202_v17 }
 0x119   : > { %v1156_v6 = vunpack.c.l.b16 %v1136_v2  ;;  %v867_v25 = vrot.slane %v2394_v40, 5  ;;  %v1550_v26 = vrot.slane %v852_v59, 9  ;;  %v1551_v27 = vrot.slane %v853_v20, 9  ;;  %v1596_v40 = vld [vmem:[#allocation2 + $0x10] sm:$0xf] }
 0x11a   : > { %v990_v5 = vpack.c.b16 %v989_v1, %v988_v0  ;;  %v1150_v7 = vsel %vm2408_vm15, %v1145_v4, %v1149_v63  ;;  %v1209_v28 = vunpack.c.l.b16 %v1199_v21  ;;  %v1210_v29 = vunpack.c.l.b16 %v1203_v22 }
 0x11b   : > { %v1157_v8 = vunpack.c.l.b16 %v1150_v7  ;;  %v864_v30 = vsel %vm2402_vm13, %v1550_v26, %v863_v24  ;;  %v868_v31 = vsel %vm2402_vm13, %v1551_v27, %v867_v25  ;;  %v1597_v36 = vor.u32 %v1673_v45, %v1596_v40  ;;  %v1809_v7 = vld [vmem:[%s2591_s7] ss:$0 sm:$0xff]  ;;  %s1917_s7 = scalar_lea.hbm %s1916_s24, 16 }
 0x11c   : > { %1582 = vmatmul.msk.bf16.vlgmr.msrb.gmra.mxu1 %vm800_vm14, %v990_v5  ;;  %v1211_v32 = vpack.c.b16 %v1210_v29, %v1209_v28  ;;  %v874_v33 = vunpack.c.l.b16 %v864_v30  ;;  %v875_v34 = vunpack.c.l.b16 %v868_v31  ;;  %p1918_p7 = scmp.ne.s32.totalorder %s1916_s24, %s1917_s7  ;;  %p1923_p6 = scmp.lt.s32.totalorder %s1921_s30, %s1917_s7 }
 0x11d   : > { %v1158_v13 = vpack.c.b16 %v1157_v8, %v1156_v6 }
 0x11e   : > { %v876_v35 = vpack.c.b16 %v875_v34, %v874_v33  ;;  %p1919_p12 = pnand %p1918_p7, %p2182_p11  ;;  %p1924_p8 = por %p1923_p6, %p1922_p5 }
 0x11f   : > { %1615 = vmatmul.msk.bf16.vlgmr.msra.gmra.mxu0 %vm800_vm14, %v1158_v13 }
 0x120   : > { %p1920_p0 = pneg %p1919_p12 }
 0x122   : > { %1549 = vmatmul.msk.bf16.vlgmr.msrb.gmra.mxu3 %vm800_vm14, %v1540_v19  ;;  %v1810_v19 = vld [vmem:[%s2592_s21] ss:$0 sm:$0xff]  ;;  %p1925_p9 = pnand %p1924_p8, %p1920_p0 }
 0x123   : > { %1109 = vmatpush.bf16.msrb.mxu3 %v1675_v18  ;;  %v1683_v18 = vld [vmem:[%s2278_s6] sm:$0xff]  }
 0x124   : > { %v1684_v59 = vunpack.c.l.bf16 %v1683_v18  ;;  %v1685_v24 = vunpack.c.h.bf16 %v1683_v18 }
 0x127   : > { %1110 = vmatpush.bf16.msrb.mxu3 %v1674_v23 }
 0x12c   : > { %1626 = vmatmul.msk.bf16.vlgmr.msra.gmra.mxu1 %vm800_vm14, %v1211_v32 }
 0x132   : > { %1560 = vmatmul.msk.bf16.vlgmr.msra.gmra.mxu3 %vm800_vm14, %v876_v35 }
 0x142   : > { %1606 = vmatmul.msk.bf16.vlgmr.msrb.gmra.mxu3 %vm800_vm14, %v1597_v36 }
 0x18c   : > { %v944_v42 = vpop.f32.mrf.mxu0 }
 0x194   : > { %v946_v49 = vpop.f32.mrf.mxu0 }
 0x195   : > { %v813_v37 = vpop.f32.mrf.mxu3 }
 0x198   : > { %v1068_v56 = vpop.f32.mrf.mxu2 }
 0x199   : > { %v1015_v43 = vpop.f32.mrf.mxu1 }
 0x19c   : > { %v1183_v60 = vpop.f32.mrf.mxu0 }
 0x19d   : > { %v815_v38 = vpop.f32.mrf.mxu3 }
 0x1a0   : > { %v1070_v2 = vpop.f32.mrf.mxu2 }
 0x1a1   : > { %v1017_v3 = vpop.f32.mrf.mxu1 }
 0x1a4   : > { %v1185_v9 = vpop.f32.mrf.mxu0 }
 0x1a5   : > { %v847_v39 = vpop.f32.mrf.mxu3 }
 0x1a6   : > { %v848_v46 = vadd.f32 %v847_v39, %v813_v37 }
 0x1a9   : > { %v1236_v63 = vpop.f32.mrf.mxu1 }
 0x1ad   : > { %v849_v41 = vpop.f32.mrf.mxu3 }
 0x1ae   : > { %v850_v52 = vadd.f32 %v849_v41, %v815_v38 }
 0x1b1   : > { %v1238_v11 = vpop.f32.mrf.mxu1 }
 0x1b5   : > { %v901_v44 = vpop.f32.mrf.mxu3 }
 0x1b6   : > { %v906_v47 = vadd.f32 %v901_v44, %v848_v46 }
 0x1b8   : > { %v949_v50 = vadd.f32 %v944_v42, %v906_v47 }
 0x1ba   : > { %v1020_v54 = vadd.f32 %v1015_v43, %v949_v50 }
 0x1bc   : > { %v1073_v58 = vadd.f32 %v1068_v56, %v1020_v54 }
 0x1bd   : > { %v903_v51 = vpop.f32.mrf.mxu3 }
 0x1be   : > { %v907_v53 = vadd.f32 %v903_v51, %v850_v52 }
 0x1c0   : > { %v950_v57 = vadd.f32 %v946_v49, %v907_v53 }
 0x1c2   : > { %v1021_v0 = vadd.f32 %v1017_v3, %v950_v57 }
 0x1c4   : > { %v1074_v4 = vadd.f32 %v1070_v2, %v1021_v0 }
 0x1c5   : > { %v1112_v61 = vpop.f32.mrf.mxu3 }
 0x1c6   : > { %v1117_v62 = vadd.f32 %v1112_v61, %v1073_v58 }
 0x1c8   : > { %v1188_v1 = vadd.f32 %v1183_v60, %v1117_v62 }
 0x1ca   : > { %v1241_v6 = vadd.f32 %v1236_v63, %v1188_v1 }
 0x1cc   : > { %v1247_v12 = vadd.f32 %v1809_v7, %v1241_v6 }
 0x1cd   : > { %v1114_v5 = vpop.f32.mrf.mxu3 }
 0x1ce   : > { %v1118_v8 = vadd.f32 %v1114_v5, %v1074_v4  ;;  %v1249_v15 = vmax.f32 %v1247_v12, 0.0 }
 0x1d0   : > { %v1189_v10 = vadd.f32 %v1185_v9, %v1118_v8 }
 0x1d2   : > { %v1242_v13 = vadd.f32 %v1238_v11, %v1189_v10 }
 0x1d4   : > { %v1248_v14 = vadd.f32 %v1809_v7, %v1242_v13 }
 0x1d6   : > { %v1250_v16 = vmax.f32 %v1248_v14, 0.0 }
 0x1d8   : > { %v1251_v17 = vpack.c.bf16 %v1250_v16, %v1249_v15 }
 0x1da   : > { %1635 = vmatmul.msk.bf16.vlgmr.msra.gmra.mxu2 %vm800_vm14, %v1251_v17 }
 0x25d   : > { %v1284_v20 = vpop.f32.mrf.mxu2 }
 0x25e   : > { %v1285_v21 = vadd.f32 %v1810_v19, %v1284_v20 }
 0x260   : > { %v1293_v22 = vadd.f32 %v1684_v59, %v1285_v21 }
 0x262   : > { %v1295_v23 = vmax.f32 %v1293_v22, 0.0 }
 0x264   : > { %1297 = vst [vmem:[%s484_s27] sm:$0xff] %v1295_v23 }
 0x265   : > { %v1286_v25 = vpop.f32.mrf.mxu2 }
 0x266   : > { %v1287_v26 = vadd.f32 %v1810_v19, %v1286_v25 }
 0x268   : > { %v1294_v27 = vadd.f32 %v1685_v24, %v1287_v26 }
 0x26a   : > { %v1296_v28 = vmax.f32 %v1294_v27, 0.0 }
 0x26c   : > { %1298 = vst [vmem:[%s484_s27 + $0x8] sm:$0xff] %v1296_v28 }
 0x26d   : > { %1928 = shalt.err (!%p1925_p9)
}
 0x26e   : > { %s2036_s25 = smov 128   ;;  %s2037_s29 = smov 8  }
 0x26f   : > { %1694 = dma.vmem_to_hbm [thread:$0]  (%p2182_p11), %s1315_s8, 256, %s1317_s28, %s1300_s23, %s2036_s25, %s2036_s25, %s2037_s29  }
 0x270 PF: > { %s2595_s0 = sld [smem:[#allocation14_spill]]  ;;  %p1714_p1 = scmp.ge.s32.totalorder %s2031_s19, 2 }
 0x272   : > { %p1708_p4 = pnand %p1714_p1, %p2201_p2 }
 0x274   : > { %p1709_p13 = pneg %p1708_p4 }
 0x276   : > { %s1331_s15 = sand.u32 1, %s2595_s0  }
 0x277   : > { %s1332_s1 = scalar_lea.sflag [#allocation5], %s1331_s15 }
 0x278   : > { %1986 = dma.done.wait (%p1709_p13), %s1332_s1, 256  }
 0x279   : > { %1988 = vsyncadd (%p1709_p13), %s1332_s1, 4294967040  ;;  %s28_s19 = sadd.s32 1, %s2031_s19   ;;  %s2597_s27 = sld [smem:[#allocation19_spill]] }
 0x27a   : > { %p25_p3 = scmp.ge.s32.totalorder %s28_s19, 10   ;;  %s2598_s6 = sld [smem:[#allocation20_spill]] }
 0x27b   : > { %s2599_s30 = smov %s1995_s10  ;;  %s2600_s10 = smov %s1999_s11 }
 0x27c   : > { %s2601_s11 = smov %s2260_s5  ;;  %s2602_s12 = smov %s2007_s13 }
 0x27d   : > { %s2603_s13 = smov %s2011_s14  ;;  %s2604_s14 = smov %s2243_s16 }
 0x27e   : > { %s2605_s15 = smov %s2023_s17  ;;  %s2606_s16 = smov %s2027_s18 }
 0x27f   : > { %s2607_s17 = smov %s2597_s27  ;;  %27 = sbr.rel (!%p25_p3) target bundleno = 20 (0x14), region = 132 }
 0x280   : > { %s2608_s18 = smov %s2598_s6 }
 0x284   :  { %1338 = vsyncpa [#allocation4], 1 }
 0x285   :  { %1340 = vsyncpa [#allocation4 + $0x1], 1 }
 0x286   :  { %1341 = vsyncpa [#allocation7], 1 }
 0x287   :  { %1343 = vsyncpa [#allocation7 + $0x1], 1 }
 0x288   :  { %1344 = vsyncpa [#allocation5], 1 }
 0x289   :  { %1346 = vsyncpa [#allocation5 + $0x1], 1 }

</bundles_post_ra>
